<compile_context>
chip_gen: v7x
topology: tpu7x:2x2x1
jax: 0.10.0
libtpu: 0.0.40
codegen_flags: <defaults>
</compile_context>

<pallas_src>
import functools

import jax
import jax.numpy as jnp
import numpy as np
from jax.experimental import pallas as pl
from jax.experimental.pallas import tpu as pltpu


def _cdiv(a, b):
    return -(-a // b)


def _round_up(a, b):
    return _cdiv(a, b) * b


def _conv_bn_lrelu_kernel(*refs, ks, stride, use_halo, neg_slope):
    if use_halo:
        xm_ref, xh_ref, w_ref, shift_ref, out_ref = refs
    else:
        xm_ref, w_ref, shift_ref, out_ref = refs
        xh_ref = None

    cout, tl = out_ref.shape
    acc = jnp.zeros((cout, tl), dtype=jnp.float32)

    # Cache the (TL + HALO, Cin) extended window per input phase.
    ext = {}
    for t in range(ks):                       # ks is small & static -> unrolled
        p, q = t % stride, t // stride
        if q == 0:
            x_t = xm_ref[p]                   # (TL, Cin)
        else:
            if p not in ext:
                ext[p] = jnp.concatenate([xm_ref[p], xh_ref[p]], axis=0)
            x_t = ext[p][q:q + tl, :]         # static sublane-offset slice
        # (Cout, Cin) x (TL, Cin)^T -> (Cout, TL), f32 accumulation on the MXU.
        acc = acc + jax.lax.dot_general(
            w_ref[t], x_t,
            dimension_numbers=(((1,), (1,)), ((), ())),
            preferred_element_type=jnp.float32)

    y = acc + shift_ref[...]                  # folded BN shift (+ conv bias)
    out_ref[...] = jnp.where(y >= 0.0, y, neg_slope * y).astype(out_ref.dtype)


def conv_bn_relu(x, weight, bias, gamma, beta, running_mean, running_var,
                 *, stride, eps=1e-5, negative_slope=0.01):
    """x: (N, Cin, L) f32 -> (N, Cout, Lout) f32. Conv1d + BN(eval) + LeakyReLU."""
    N, Cin, L = x.shape
    Cout, _, ks = weight.shape
    pad = (ks - 1) // 2
    Lout = (L + 2 * pad - ks) // stride + 1

    HALO = 128
    TL = int(min(512, _round_up(Lout, 128)))       # output-length tile (lane dim)
    ntiles = _cdiv(Lout, TL)
    Lout_p = ntiles * TL
    qmax = (ks - 1) // stride                      # tap reach into the next tile
    use_halo = qmax > 0
    assert qmax < HALO, "kernel size too large for 128-wide halo"

    # Polyphase view of the zero-padded input: xph[n, p, i, c] = xpad[n, c, i*stride + p]
    Lpad = L + 2 * pad
    Lph = max(Lout_p + HALO, _cdiv(Lpad, stride))
    xp = jnp.pad(x, ((0, 0), (0, 0), (pad, pad + (Lph * stride - Lpad))))
    xph = xp.reshape(N, Cin, Lph, stride).transpose(0, 3, 2, 1)   # (N, s, Lph, Cin)

    # Fold BN (eval, running stats) + conv bias into per-channel weights/shift.
    scale = gamma * jax.lax.rsqrt(running_var + eps)              # (Cout,)
    w_f = (weight * scale[:, None, None]).transpose(2, 0, 1)      # (ks, Cout, Cin)
    w_f = w_f.astype(jnp.float32)
    shift = (beta + (bias - running_mean) * scale).reshape(Cout, 1).astype(jnp.float32)

    kernel = functools.partial(_conv_bn_lrelu_kernel, ks=ks, stride=stride,
                               use_halo=use_halo, neg_slope=negative_slope)

    main_spec = pl.BlockSpec((None, stride, TL, Cin), lambda n, j: (n, 0, j, 0))
    halo_spec = pl.BlockSpec((None, stride, HALO, Cin),
                             lambda n, j: (n, 0, (j + 1) * (TL // HALO), 0))
    w_spec = pl.BlockSpec((ks, Cout, Cin), lambda n, j: (0, 0, 0))
    shift_spec = pl.BlockSpec((Cout, 1), lambda n, j: (0, 0))
    in_specs = [main_spec] + ([halo_spec] if use_halo else []) + [w_spec, shift_spec]
    args = (xph, xph, w_f, shift) if use_halo else (xph, w_f, shift)

    cost = pl.CostEstimate(
        flops=int(2 * N * Lout_p * Cout * Cin * ks),
        transcendentals=0,
        bytes_accessed=int(4 * (xph.size + w_f.size + shift.size + N * Cout * Lout_p)))

    out = pl.pallas_call(
        kernel,
        out_shape=jax.ShapeDtypeStruct((N, Cout, Lout_p), jnp.float32),
        grid=(N, ntiles),
        in_specs=in_specs,
        out_specs=pl.BlockSpec((None, Cout, TL), lambda n, j: (n, 0, j)),
        compiler_params=pltpu.CompilerParams(
            dimension_semantics=("parallel", "parallel"),
            vmem_limit_bytes=32 * 1024 * 1024),
        cost_estimate=cost,
    )(*args)

    return out[:, :, :Lout]                        # drop Lout padding; already NCL


def _reference(x, weight, bias, gamma, beta, running_mean, running_var,
               *, stride, eps=1e-5, negative_slope=0.01):
    """Pure-JAX reference (lax conv + eval BN + LeakyReLU)."""
    pad = (weight.shape[-1] - 1) // 2
    y = jax.lax.conv_general_dilated(
        x, weight, window_strides=(stride,), padding=[(pad, pad)],
        dimension_numbers=("NCH", "OIH", "NCH"))
    y = y + bias[None, :, None]
    y = (y - running_mean[None, :, None]) / jnp.sqrt(
        running_var[None, :, None] + eps)
    y = y * gamma[None, :, None] + beta[None, :, None]
    return jnp.where(y >= 0, y, negative_slope * y)


if __name__ == "__main__":
    # Module hyperparameters (ConvBNReLU(nin, nout, stride, ks)), small shapes.
    nin, nout, stride, ks = 4, 8, 2, 3
    N, L = 2, 16

    key = jax.random.PRNGKey(0)
    kx, kw, kb, kg, kbe, km, kv = jax.random.split(key, 7)

    x = jax.random.normal(kx, (N, nin, L), dtype=jnp.float32)

    # Deterministic synthetic parameters (shapes from nn.Conv1d / nn.BatchNorm1d).
    weight = jax.random.normal(kw, (nout, nin, ks), dtype=jnp.float32) * 0.1
    bias = jax.random.normal(kb, (nout,), dtype=jnp.float32) * 0.1
    gamma = 1.0 + 0.1 * jax.random.normal(kg, (nout,), dtype=jnp.float32)
    beta = 0.1 * jax.random.normal(kbe, (nout,), dtype=jnp.float32)
    running_mean = 0.1 * jax.random.normal(km, (nout,), dtype=jnp.float32)
    running_var = jnp.abs(jax.random.normal(kv, (nout,), dtype=jnp.float32)) + 0.5

    out = conv_bn_relu(x, weight, bias, gamma, beta, running_mean, running_var,
                       stride=stride)
    out = jax.block_until_ready(out)

    ref = _reference(x, weight, bias, gamma, beta, running_mean, running_var,
                     stride=stride)
    ref = jax.block_until_ready(ref)

    assert out.shape == ref.shape, (out.shape, ref.shape)
    np.testing.assert_allclose(np.asarray(out), np.asarray(ref),
                               rtol=1e-5, atol=1e-5)
    print("KERNEL_OK")
</pallas_src>

<mosaic_0001>
module attributes {stable_mosaic.version = 11 : i64} {
  func.func @_conv_bn_lrelu_kernel(%arg0: i32, %arg1: i32, %arg2: memref<1x2x128x4xf32, #tpu.memory_space<vmem>>, %arg3: memref<1x2x128x4xf32, #tpu.memory_space<vmem>>, %arg4: memref<3x8x4xf32, #tpu.memory_space<vmem>>, %arg5: memref<8x1xf32, #tpu.memory_space<vmem>>, %arg6: memref<1x8x128xf32, #tpu.memory_space<vmem>>) attributes {dimension_semantics = [#tpu.dimension_semantics<parallel>, #tpu.dimension_semantics<parallel>], iteration_bounds = array<i64: 2, 1>, scalar_prefetch = 0 : i64, scratch_operands = 0 : i64, tpu.core_type = #tpu.core_type<tc>, window_params = [{transform_indices = @transform_0, window_bounds = array<i64: 1, 2, 128, 4>}, {transform_indices = @transform_1, window_bounds = array<i64: 1, 2, 128, 4>}, {pipeline_mode = #tpu.pipeline_mode<synchronous>, transform_indices = @transform_2, window_bounds = array<i64: 3, 8, 4>}, {pipeline_mode = #tpu.pipeline_mode<synchronous>, transform_indices = @transform_3, window_bounds = array<i64: 8, 1>}, {transform_indices = @transform_4, window_bounds = array<i64: 1, 8, 128>}]} {
    %cst = arith.constant 0.000000e+00 : f32
    %0 = vector.broadcast %cst : f32 to vector<8x128xf32>
    %c0 = arith.constant 0 : index
    %c0_0 = arith.constant 0 : index
    %c0_1 = arith.constant 0 : index
    %c0_2 = arith.constant 0 : index
    %1 = vector.load %arg2[%c0, %c0_0, %c0_1, %c0_2] : memref<1x2x128x4xf32, #tpu.memory_space<vmem>>, vector<1x1x128x4xf32>
    %2 = vector.shape_cast %1 : vector<1x1x128x4xf32> to vector<128x4xf32>
    %c0_3 = arith.constant 0 : index
    %c0_4 = arith.constant 0 : index
    %c0_5 = arith.constant 0 : index
    %3 = vector.load %arg4[%c0_3, %c0_4, %c0_5] : memref<3x8x4xf32, #tpu.memory_space<vmem>>, vector<1x8x4xf32>
    %4 = vector.shape_cast %3 : vector<1x8x4xf32> to vector<8x4xf32>
    %cst_6 = arith.constant dense<0.000000e+00> : vector<8x128xf32>
    %5 = tpu.matmul %4, %2, %cst_6 {dimension_numbers = #tpu.dot_dimension_numbers<[1], [1], [0], [0], [0, 0, 1, 0], [], []>} : vector<8x4xf32>, vector<128x4xf32>, vector<8x128xf32> -> vector<8x128xf32>
    %6 = arith.addf %0, %5 : vector<8x128xf32>
    %c0_7 = arith.constant 0 : index
    %c1 = arith.constant 1 : index
    %c0_8 = arith.constant 0 : index
    %c0_9 = arith.constant 0 : index
    %7 = vector.load %arg2[%c0_7, %c1, %c0_8, %c0_9] : memref<1x2x128x4xf32, #tpu.memory_space<vmem>>, vector<1x1x128x4xf32>
    %8 = vector.shape_cast %7 : vector<1x1x128x4xf32> to vector<128x4xf32>
    %c1_10 = arith.constant 1 : index
    %c0_11 = arith.constant 0 : index
    %c0_12 = arith.constant 0 : index
    %9 = vector.load %arg4[%c1_10, %c0_11, %c0_12] : memref<3x8x4xf32, #tpu.memory_space<vmem>>, vector<1x8x4xf32>
    %10 = vector.shape_cast %9 : vector<1x8x4xf32> to vector<8x4xf32>
    %cst_13 = arith.constant dense<0.000000e+00> : vector<8x128xf32>
    %11 = tpu.matmul %10, %8, %cst_13 {dimension_numbers = #tpu.dot_dimension_numbers<[1], [1], [0], [0], [0, 0, 1, 0], [], []>} : vector<8x4xf32>, vector<128x4xf32>, vector<8x128xf32> -> vector<8x128xf32>
    %12 = arith.addf %6, %11 : vector<8x128xf32>
    %c0_14 = arith.constant 0 : index
    %c0_15 = arith.constant 0 : index
    %c0_16 = arith.constant 0 : index
    %c0_17 = arith.constant 0 : index
    %13 = vector.load %arg2[%c0_14, %c0_15, %c0_16, %c0_17] : memref<1x2x128x4xf32, #tpu.memory_space<vmem>>, vector<1x1x128x4xf32>
    %14 = vector.shape_cast %13 : vector<1x1x128x4xf32> to vector<128x4xf32>
    %c0_18 = arith.constant 0 : index
    %c0_19 = arith.constant 0 : index
    %c0_20 = arith.constant 0 : index
    %c0_21 = arith.constant 0 : index
    %15 = vector.load %arg3[%c0_18, %c0_19, %c0_20, %c0_21] : memref<1x2x128x4xf32, #tpu.memory_space<vmem>>, vector<1x1x128x4xf32>
    %16 = vector.shape_cast %15 : vector<1x1x128x4xf32> to vector<128x4xf32>
    %17 = tpu.concatenate %14, %16 in 0 : vector<128x4xf32>, vector<128x4xf32> -> vector<256x4xf32>
    %18 = vector.extract_strided_slice %17 {offsets = [1, 0], sizes = [128, 4], strides = [1, 1]} : vector<256x4xf32> to vector<128x4xf32>
    %c2 = arith.constant 2 : index
    %c0_22 = arith.constant 0 : index
    %c0_23 = arith.constant 0 : index
    %19 = vector.load %arg4[%c2, %c0_22, %c0_23] : memref<3x8x4xf32, #tpu.memory_space<vmem>>, vector<1x8x4xf32>
    %20 = vector.shape_cast %19 : vector<1x8x4xf32> to vector<8x4xf32>
    %cst_24 = arith.constant dense<0.000000e+00> : vector<8x128xf32>
    %21 = tpu.matmul %20, %18, %cst_24 {dimension_numbers = #tpu.dot_dimension_numbers<[1], [1], [0], [0], [0, 0, 1, 0], [], []>} : vector<8x4xf32>, vector<128x4xf32>, vector<8x128xf32> -> vector<8x128xf32>
    %22 = arith.addf %12, %21 : vector<8x128xf32>
    %c0_25 = arith.constant 0 : index
    %c0_26 = arith.constant 0 : index
    %23 = vector.load %arg5[%c0_25, %c0_26] : memref<8x1xf32, #tpu.memory_space<vmem>>, vector<8x1xf32>
    %24 = vector.broadcast %23 : vector<8x1xf32> to vector<8x128xf32>
    %25 = arith.addf %22, %24 : vector<8x128xf32>
    %cst_27 = arith.constant 0.000000e+00 : f32
    %26 = vector.broadcast %cst_27 : f32 to vector<8x128xf32>
    %27 = arith.cmpf oge, %25, %26 : vector<8x128xf32>
    %cst_28 = arith.constant 0.00999999977 : f32
    %28 = vector.broadcast %cst_28 : f32 to vector<8x128xf32>
    %29 = arith.mulf %28, %25 : vector<8x128xf32>
    %30 = arith.select %27, %25, %29 : vector<8x128xi1>, vector<8x128xf32>
    %c0_29 = arith.constant 0 : index
    %c0_30 = arith.constant 0 : index
    %c0_31 = arith.constant 0 : index
    %31 = vector.load %arg6[%c0_29, %c0_30, %c0_31] : memref<1x8x128xf32, #tpu.memory_space<vmem>>, vector<1x8x128xf32>
    %32 = vector.shape_cast %31 : vector<1x8x128xf32> to vector<8x128xf32>
    %33 = vector.shape_cast %30 : vector<8x128xf32> to vector<1x8x128xf32>
    tpu.vector_store %arg6[%c0_29, %c0_30, %c0_31], %33 {strides = array<i32>} : memref<1x8x128xf32, #tpu.memory_space<vmem>>, vector<1x8x128xf32>,
    return
  }
  func.func @transform_0(%arg0: i32, %arg1: i32) -> (i32, i32, i32, i32) {
    %c0_i32 = arith.constant 0 : i32
    %c0_i32_0 = arith.constant 0 : i32
    %c0_i32_1 = arith.constant 0 : i32
    return %arg0, %c0_i32, %arg1, %c0_i32_0 : i32, i32, i32, i32
  }
  func.func @transform_1(%arg0: i32, %arg1: i32) -> (i32, i32, i32, i32) {
    %c1_i32 = arith.constant 1 : i32
    %0 = arith.addi %arg1, %c1_i32 : i32
    %c1_i32_0 = arith.constant 1 : i32
    %1 = arith.muli %0, %c1_i32_0 : i32
    %c0_i32 = arith.constant 0 : i32
    %c0_i32_1 = arith.constant 0 : i32
    %c0_i32_2 = arith.constant 0 : i32
    return %arg0, %c0_i32, %1, %c0_i32_1 : i32, i32, i32, i32
  }
  func.func @transform_2(%arg0: i32, %arg1: i32) -> (i32, i32, i32) {
    %c0_i32 = arith.constant 0 : i32
    %c0_i32_0 = arith.constant 0 : i32
    %c0_i32_1 = arith.constant 0 : i32
    %c0_i32_2 = arith.constant 0 : i32
    return %c0_i32, %c0_i32_0, %c0_i32_1 : i32, i32, i32
  }
  func.func @transform_3(%arg0: i32, %arg1: i32) -> (i32, i32) {
    %c0_i32 = arith.constant 0 : i32
    %c0_i32_0 = arith.constant 0 : i32
    %c0_i32_1 = arith.constant 0 : i32
    return %c0_i32, %c0_i32_0 : i32, i32
  }
  func.func @transform_4(%arg0: i32, %arg1: i32) -> (i32, i32, i32) {
    %c0_i32 = arith.constant 0 : i32
    %c0_i32_0 = arith.constant 0 : i32
    return %arg0, %c0_i32, %arg1 : i32, i32, i32
  }
}

</mosaic_0001>

<bundles_post_ra>
// kernel: tpu_custom_call.1
= control target key start
LH: loop header
LB: loop body
LE: loop exit
PB: predicated region body
PF: predicated region fallthrough
CT: control target
= control target key end

     0   :  { %9 = vsyncpa [#allocation5], 0  ;;  %s2141_s0 = inlined_call_operand.vmem [shape: f32[2,2,256,4], index: 0, kind: input, shape index: {}]   ;;  %s2142_s1 = inlined_call_operand.vmem [shape: f32[2,2,256,4], index: 1, kind: input, shape index: {}]   ;;  %s2143_s2 = inlined_call_operand.vmem [shape: f32[3,8,4], index: 2, kind: input, shape index: {}]   ;;  %s2144_s3 = inlined_call_operand.vmem [shape: f32[8,1], index: 3, kind: input, shape index: {}]   ;;  %s2145_s4 = inlined_call_operand.hbm [shape: f32[2,8,128], index: 4, kind: output, shape index: {}]  }
   0x1   :  { %11 = vsyncpa [#allocation5 + $0x1], 0  ;;  %s1653_s15 = smov 0   ;;  %s1655_s16 = smov 0  }
   0x2   :  { %s1657_s17 = smov 0   ;;  %s1659_s18 = smov 0  }
   0x3   :  { %s1661_s19 = smov 0   ;;  %s1663_s20 = smov 0  }
   0x4 LB: > { %s1110_s21 = sadd.s32 4294967295, %s1621_s20   ;;  %s1111_s22 = sadd.s32 4294967294, %s1621_s20   ;;  %s1621_s20 = sphi %s1663_s20, %s17_s20   ;;  %s1617_s19 = sphi %s1661_s19, %s2155_s19   ;;  %s1613_s18 = sphi %s1659_s18, %s2154_s18   ;;  %s1609_s17 = sphi %s1657_s17, %s2153_s17   ;;  %s1605_s16 = sphi %s1655_s16, %s2152_s16   ;;  %s1601_s15 = sphi %s1653_s15, %s2151_s15  }
   0x5   : > { %s29_s23 = sadd.s32 1, %s1617_s19  ;;  %s38_s24 = sadd.s32 1, %s1609_s17 }
   0x6   : > { %p31_p0 = scmp.ge.s32.totalorder %s29_s23, 2  ;;  %p45_p1 = scmp.ne.s32.totalorder %s1609_s17, %s1605_s16 }
   0x7   : > { %p46_p2 = scmp.eq.s32.totalorder %s1621_s20, 0  ;;  %p149_p3 = scmp.eq.s32.totalorder %s1110_s21, 1 }
   0x8   : > { %s2157_s23 = smov (%p31_p0, %s29_s23), 0  ;;  %p154_p6 = scmp.ne.s32.totalorder %s1605_s16, %s1601_s15 }
   0x9   : > { %p1692_p4 = por %p46_p2, %p45_p1  ;;  %p1696_p5 = por %p149_p3, %p45_p1 }
   0xa   : > { %s33_s27 = ssub.s32 %s1617_s19, %s2157_s23  ;;  %p155_p8 = scmp.eq.s32.totalorder %s1111_s22, 1 }
   0xb   : > { %p36_p7 = scmp.eq.s32.totalorder %s33_s27, 0  ;;  %p1113_p10 = scmp.ge.s32.totalorder %s1621_s20, 2 }
   0xc   : > { %p1707_p9 = por %p155_p8, %p154_p6 }
   0xd   : > { %s1705_s28 = scalar_select %p36_p7, %s1609_s17, %s38_s24  }
   0xe   : > { %177 = sbr.rel (%p1113_p10) target bundleno = 61 (0x3d), region = 24 }
  0x15   : > { %180 = sbr.rel (!%p1692_p4) target bundleno = 41 (0x29), region = 28  ;;  %s182_s30 = sand.u32 (%p1692_p4), 1, %s1609_s17  }
  0x16   : > { %s1229_s5 = sshll.u32 (%p1692_p4), %s1617_s19, 9  ;;  %s1114_s6 = sshll.u32 (%p1692_p4), %s182_s30, 8 }
  0x17   : > { %s1721_s9 = scalar_lea.vmem (%p1692_p4), %s2141_s0, %s1229_s5  ;;  %s1726_s10 = scalar_lea.vmem (%p1692_p4), [#allocation2], %s1114_s6 }
  0x18   : > { %v279_v0 = vld [vmem:[%s1721_s9] sm:$0xff] (%p1692_p4)  ;;  %v281_v1 = vld [vmem:[%s1721_s9 + $0x8] sm:$0xff] (%p1692_p4)  ;;  %v283_v2 = vld [vmem:[%s1721_s9 + $0x10] sm:$0xff] (%p1692_p4) }
  0x19   : > { %280 = vst [vmem:[%s1726_s10] sm:$0xff] (%p1692_p4), %v279_v0  ;;  %282 = vst [vmem:[%s1726_s10 + $0x8] sm:$0xff] (%p1692_p4), %v281_v1  ;;  %v285_v3 = vld [vmem:[%s1721_s9 + $0x18] sm:$0xff] (%p1692_p4)  ;;  %v287_v4 = vld [vmem:[%s1721_s9 + $0x20] sm:$0xff] (%p1692_p4) }
  0x1a   : > { %284 = vst [vmem:[%s1726_s10 + $0x10] sm:$0xff] (%p1692_p4), %v283_v2  ;;  %v289_v5 = vld [vmem:[%s1721_s9 + $0x28] sm:$0xff] (%p1692_p4)  ;;  %286 = vst [vmem:[%s1726_s10 + $0x18] sm:$0xff] (%p1692_p4), %v285_v3  ;;  %v291_v6 = vld [vmem:[%s1721_s9 + $0x30] sm:$0xff] (%p1692_p4) }
  0x1b   : > { %288 = vst [vmem:[%s1726_s10 + $0x20] sm:$0xff] (%p1692_p4), %v287_v4  ;;  %290 = vst [vmem:[%s1726_s10 + $0x28] sm:$0xff] (%p1692_p4), %v289_v5  ;;  %v293_v7 = vld [vmem:[%s1721_s9 + $0x38] sm:$0xff] (%p1692_p4)  ;;  %v295_v8 = vld [vmem:[%s1721_s9 + $0x40] sm:$0xff] (%p1692_p4) }
  0x1c   : > { %292 = vst [vmem:[%s1726_s10 + $0x30] sm:$0xff] %v291_v6  ;;  %294 = vst [vmem:[%s1726_s10 + $0x38] sm:$0xff] %v293_v7  ;;  %v297_v9 = vld [vmem:[%s1721_s9 + $0x48] sm:$0xff]  ;;  %v299_v10 = vld [vmem:[%s1721_s9 + $0x50] sm:$0xff] }
  0x1d   : > { %296 = vst [vmem:[%s1726_s10 + $0x40] sm:$0xff] %v295_v8  ;;  %v301_v11 = vld [vmem:[%s1721_s9 + $0x58] sm:$0xff]  ;;  %298 = vst [vmem:[%s1726_s10 + $0x48] sm:$0xff] %v297_v9  ;;  %v303_v12 = vld [vmem:[%s1721_s9 + $0x60] sm:$0xff] }
  0x1e   : > { %300 = vst [vmem:[%s1726_s10 + $0x50] sm:$0xff] %v299_v10  ;;  %302 = vst [vmem:[%s1726_s10 + $0x58] sm:$0xff] %v301_v11  ;;  %v305_v13 = vld [vmem:[%s1721_s9 + $0x68] sm:$0xff]  ;;  %v307_v14 = vld [vmem:[%s1721_s9 + $0x70] sm:$0xff] }
  0x1f   : > { %304 = vst [vmem:[%s1726_s10 + $0x60] sm:$0xff] %v303_v12  ;;  %306 = vst [vmem:[%s1726_s10 + $0x68] sm:$0xff] %v305_v13  ;;  %v309_v15 = vld [vmem:[%s1721_s9 + $0x78] sm:$0xff]  ;;  %v311_v16 = vld [vmem:[%s1721_s9 + $0x100] sm:$0xff] }
  0x20   : > { %308 = vst [vmem:[%s1726_s10 + $0x70] sm:$0xff] %v307_v14  ;;  %v313_v17 = vld [vmem:[%s1721_s9 + $0x108] sm:$0xff]  ;;  %310 = vst [vmem:[%s1726_s10 + $0x78] sm:$0xff] %v309_v15  ;;  %v315_v18 = vld [vmem:[%s1721_s9 + $0x110] sm:$0xff] }
  0x21   : > { %312 = vst [vmem:[%s1726_s10 + $0x80] sm:$0xff] %v311_v16  ;;  %314 = vst [vmem:[%s1726_s10 + $0x88] sm:$0xff] %v313_v17  ;;  %v317_v19 = vld [vmem:[%s1721_s9 + $0x118] sm:$0xff]  ;;  %v319_v20 = vld [vmem:[%s1721_s9 + $0x120] sm:$0xff] }
  0x22   : > { %316 = vst [vmem:[%s1726_s10 + $0x90] sm:$0xff] %v315_v18  ;;  %318 = vst [vmem:[%s1726_s10 + $0x98] sm:$0xff] %v317_v19  ;;  %v321_v21 = vld [vmem:[%s1721_s9 + $0x128] sm:$0xff]  ;;  %v323_v22 = vld [vmem:[%s1721_s9 + $0x130] sm:$0xff] }
  0x23   : > { %320 = vst [vmem:[%s1726_s10 + $0xa0] sm:$0xff] %v319_v20  ;;  %v325_v23 = vld [vmem:[%s1721_s9 + $0x138] sm:$0xff]  ;;  %322 = vst [vmem:[%s1726_s10 + $0xa8] sm:$0xff] %v321_v21  ;;  %v327_v24 = vld [vmem:[%s1721_s9 + $0x140] sm:$0xff] }
  0x24   : > { %324 = vst [vmem:[%s1726_s10 + $0xb0] sm:$0xff] %v323_v22  ;;  %326 = vst [vmem:[%s1726_s10 + $0xb8] sm:$0xff] %v325_v23  ;;  %v329_v25 = vld [vmem:[%s1721_s9 + $0x148] sm:$0xff]  ;;  %v331_v26 = vld [vmem:[%s1721_s9 + $0x150] sm:$0xff] }
  0x25   : > { %328 = vst [vmem:[%s1726_s10 + $0xc0] sm:$0xff] %v327_v24  ;;  %330 = vst [vmem:[%s1726_s10 + $0xc8] sm:$0xff] %v329_v25  ;;  %v333_v27 = vld [vmem:[%s1721_s9 + $0x158] sm:$0xff]  ;;  %v335_v28 = vld [vmem:[%s1721_s9 + $0x160] sm:$0xff] }
  0x26   : > { %332 = vst [vmem:[%s1726_s10 + $0xd0] sm:$0xff] %v331_v26  ;;  %v337_v29 = vld [vmem:[%s1721_s9 + $0x168] sm:$0xff]  ;;  %334 = vst [vmem:[%s1726_s10 + $0xd8] sm:$0xff] %v333_v27  ;;  %v339_v30 = vld [vmem:[%s1721_s9 + $0x170] sm:$0xff] }
  0x27   : > { %336 = vst [vmem:[%s1726_s10 + $0xe0] sm:$0xff] %v335_v28  ;;  %338 = vst [vmem:[%s1726_s10 + $0xe8] sm:$0xff] %v337_v29  ;;  %v341_v31 = vld [vmem:[%s1721_s9 + $0x178] sm:$0xff] }
  0x28   : > { %340 = vst [vmem:[%s1726_s10 + $0xf0] sm:$0xff] %v339_v30  ;;  %342 = vst [vmem:[%s1726_s10 + $0xf8] sm:$0xff] %v341_v31 }
  0x29 PF: > { %348 = sbr.rel (!%p1692_p4) target bundleno = 61 (0x3d), region = 66  ;;  %s350_s11 = sand.u32 (%p1692_p4), 1, %s1609_s17  }
  0x2a   : > { %s1230_s12 = sshll.u32 (%p1692_p4), %s1617_s19, 9  ;;  %s1117_s13 = sshll.u32 (%p1692_p4), %s350_s11, 8 }
  0x2b   : > { %s1796_s22 = scalar_lea.vmem (%p1692_p4), %s2142_s1, %s1230_s12  ;;  %s1801_s24 = scalar_lea.vmem (%p1692_p4), [#allocation3], %s1117_s13 }
  0x2c   : > { %v1120_v32 = vld [vmem:[%s1796_s22 + $0x80] sm:$0xff] (%p1692_p4)  ;;  %v1121_v33 = vld [vmem:[%s1796_s22 + $0x88] sm:$0xff] (%p1692_p4)  ;;  %v1122_v34 = vld [vmem:[%s1796_s22 + $0x90] sm:$0xff] (%p1692_p4) }
  0x2d   : > { %449 = vst [vmem:[%s1801_s24] sm:$0xff] (%p1692_p4), %v1120_v32  ;;  %451 = vst [vmem:[%s1801_s24 + $0x8] sm:$0xff] (%p1692_p4), %v1121_v33  ;;  %v1123_v35 = vld [vmem:[%s1796_s22 + $0x98] sm:$0xff] (%p1692_p4)  ;;  %v1124_v36 = vld [vmem:[%s1796_s22 + $0xa0] sm:$0xff] (%p1692_p4) }
  0x2e   : > { %453 = vst [vmem:[%s1801_s24 + $0x10] sm:$0xff] (%p1692_p4), %v1122_v34  ;;  %v1125_v37 = vld [vmem:[%s1796_s22 + $0xa8] sm:$0xff] (%p1692_p4)  ;;  %455 = vst [vmem:[%s1801_s24 + $0x18] sm:$0xff] (%p1692_p4), %v1123_v35  ;;  %v1126_v38 = vld [vmem:[%s1796_s22 + $0xb0] sm:$0xff] (%p1692_p4) }
  0x2f   : > { %457 = vst [vmem:[%s1801_s24 + $0x20] sm:$0xff] (%p1692_p4), %v1124_v36  ;;  %459 = vst [vmem:[%s1801_s24 + $0x28] sm:$0xff] (%p1692_p4), %v1125_v37  ;;  %v1127_v39 = vld [vmem:[%s1796_s22 + $0xb8] sm:$0xff] (%p1692_p4)  ;;  %v1128_v40 = vld [vmem:[%s1796_s22 + $0xc0] sm:$0xff] (%p1692_p4) }
  0x30   : > { %461 = vst [vmem:[%s1801_s24 + $0x30] sm:$0xff] %v1126_v38  ;;  %463 = vst [vmem:[%s1801_s24 + $0x38] sm:$0xff] %v1127_v39  ;;  %v1129_v41 = vld [vmem:[%s1796_s22 + $0xc8] sm:$0xff]  ;;  %v1130_v42 = vld [vmem:[%s1796_s22 + $0xd0] sm:$0xff] }
  0x31   : > { %465 = vst [vmem:[%s1801_s24 + $0x40] sm:$0xff] %v1128_v40  ;;  %v1131_v43 = vld [vmem:[%s1796_s22 + $0xd8] sm:$0xff]  ;;  %467 = vst [vmem:[%s1801_s24 + $0x48] sm:$0xff] %v1129_v41  ;;  %v1132_v44 = vld [vmem:[%s1796_s22 + $0xe0] sm:$0xff] }
  0x32   : > { %469 = vst [vmem:[%s1801_s24 + $0x50] sm:$0xff] %v1130_v42  ;;  %471 = vst [vmem:[%s1801_s24 + $0x58] sm:$0xff] %v1131_v43  ;;  %v1133_v45 = vld [vmem:[%s1796_s22 + $0xe8] sm:$0xff]  ;;  %v1134_v46 = vld [vmem:[%s1796_s22 + $0xf0] sm:$0xff] }
  0x33   : > { %473 = vst [vmem:[%s1801_s24 + $0x60] sm:$0xff] %v1132_v44  ;;  %475 = vst [vmem:[%s1801_s24 + $0x68] sm:$0xff] %v1133_v45  ;;  %v1135_v47 = vld [vmem:[%s1796_s22 + $0xf8] sm:$0xff]  ;;  %v1136_v48 = vld [vmem:[%s1796_s22 + $0x180] sm:$0xff] }
  0x34   : > { %477 = vst [vmem:[%s1801_s24 + $0x70] sm:$0xff] %v1134_v46  ;;  %v1137_v49 = vld [vmem:[%s1796_s22 + $0x188] sm:$0xff]  ;;  %479 = vst [vmem:[%s1801_s24 + $0x78] sm:$0xff] %v1135_v47  ;;  %v1138_v50 = vld [vmem:[%s1796_s22 + $0x190] sm:$0xff] }
  0x35   : > { %481 = vst [vmem:[%s1801_s24 + $0x80] sm:$0xff] %v1136_v48  ;;  %483 = vst [vmem:[%s1801_s24 + $0x88] sm:$0xff] %v1137_v49  ;;  %v1139_v51 = vld [vmem:[%s1796_s22 + $0x198] sm:$0xff]  ;;  %v1140_v52 = vld [vmem:[%s1796_s22 + $0x1a0] sm:$0xff] }
  0x36   : > { %485 = vst [vmem:[%s1801_s24 + $0x90] sm:$0xff] %v1138_v50  ;;  %487 = vst [vmem:[%s1801_s24 + $0x98] sm:$0xff] %v1139_v51  ;;  %v1141_v53 = vld [vmem:[%s1796_s22 + $0x1a8] sm:$0xff]  ;;  %v1142_v54 = vld [vmem:[%s1796_s22 + $0x1b0] sm:$0xff] }
  0x37   : > { %489 = vst [vmem:[%s1801_s24 + $0xa0] sm:$0xff] %v1140_v52  ;;  %v1143_v55 = vld [vmem:[%s1796_s22 + $0x1b8] sm:$0xff]  ;;  %491 = vst [vmem:[%s1801_s24 + $0xa8] sm:$0xff] %v1141_v53  ;;  %v1144_v56 = vld [vmem:[%s1796_s22 + $0x1c0] sm:$0xff] }
  0x38   : > { %493 = vst [vmem:[%s1801_s24 + $0xb0] sm:$0xff] %v1142_v54  ;;  %495 = vst [vmem:[%s1801_s24 + $0xb8] sm:$0xff] %v1143_v55  ;;  %v1145_v57 = vld [vmem:[%s1796_s22 + $0x1c8] sm:$0xff]  ;;  %v1146_v58 = vld [vmem:[%s1796_s22 + $0x1d0] sm:$0xff] }
  0x39   : > { %497 = vst [vmem:[%s1801_s24 + $0xc0] sm:$0xff] %v1144_v56  ;;  %499 = vst [vmem:[%s1801_s24 + $0xc8] sm:$0xff] %v1145_v57  ;;  %v1147_v59 = vld [vmem:[%s1796_s22 + $0x1d8] sm:$0xff]  ;;  %v1148_v60 = vld [vmem:[%s1796_s22 + $0x1e0] sm:$0xff] }
  0x3a   : > { %501 = vst [vmem:[%s1801_s24 + $0xd0] sm:$0xff] %v1146_v58  ;;  %v1149_v61 = vld [vmem:[%s1796_s22 + $0x1e8] sm:$0xff]  ;;  %503 = vst [vmem:[%s1801_s24 + $0xd8] sm:$0xff] %v1147_v59  ;;  %v1150_v62 = vld [vmem:[%s1796_s22 + $0x1f0] sm:$0xff] }
  0x3b   : > { %505 = vst [vmem:[%s1801_s24 + $0xe0] sm:$0xff] %v1148_v60  ;;  %507 = vst [vmem:[%s1801_s24 + $0xe8] sm:$0xff] %v1149_v61  ;;  %v1151_v63 = vld [vmem:[%s1796_s22 + $0x1f8] sm:$0xff] }
  0x3c   : > { %509 = vst [vmem:[%s1801_s24 + $0xf0] sm:$0xff] %v1150_v62  ;;  %511 = vst [vmem:[%s1801_s24 + $0xf8] sm:$0xff] %v1151_v63 }
  0x3d PF: > { %p1152_p11 = scmp.ge.s32.totalorder %s1621_s20, 1  ;;  %p516_p12 = scmp.lt.s32.totalorder %s1621_s20, 3 }
  0x3f   : > { %p517_p13 = pnand %p1152_p11, %p516_p12 }
  0x40   : > { %s1867_s25 = sand.u32 (!%p517_p13), 1, %s1605_s16   ;;  %vm598_vm0 = vcmask (!%p517_p13), 31744   ;;  %v1623_v0 = vmov (!%p517_p13), 0.0|0.0   ;;  %vm1624_vm2 = vmmov (!%p517_p13), 0   ;;  %v1625_v2 = vmov (!%p517_p13), 0.0   ;;  %v985_v16 = vld [vmem:[%s2144_s3] sm:$0xff] (!%p517_p13) }
  0x41   : > { %520 = sbr.rel (%p517_p13) target bundleno = 430 (0x1ae), region = 104  ;;  %1387 = vmatprep.subr.bf16.mxu0 (!%p517_p13), %v1623_v0  ;;  %s1153_s27 = sshll.u32 (!%p517_p13), %s1867_s25, 8  ;;  %1419 = vmatprep.subr.bf16.mxu1 (!%p517_p13), %v1623_v0  ;;  %vm1874_vm1 = vmpackc.low (!%p517_p13), %vm598_vm0, %vm598_vm0  ;;  %v1626_v9 = vmov (!%p517_p13), 0   ;;  %vm845_vm3 = vcmask (!%p517_p13), 1046528   ;;  %v1172_v58 = vld [vmem:[%s2143_s2 + $0x8] sm:$0xff] (!%p517_p13)  ;;  %v578_v62 = vld [vmem:[%s2143_s2] sm:$0xff] (!%p517_p13) }
  0x42   : > { %1314 = vmatprep.mubr.msk.f32.mxu0 (!%p517_p13), %vm1624_vm2, %v1625_v2  ;;  %1349 = vmatprep.mubr.msk.f32.mxu1 (!%p517_p13), %vm1624_vm2, %v1625_v2  ;;  %s1884_s30 = scalar_lea.vmem (!%p517_p13), [#allocation2], %s1153_s27  ;;  %s532_s11 = scalar_lea.vmem (!%p517_p13), [#allocation3], %s1153_s27 }
  0x43   : > { %v1156_v3 = vld [vmem:[%s1884_s30 + $0x80] sm:$0xff] (!%p517_p13)  ;;  %v1157_v4 = vld [vmem:[%s1884_s30 + $0x88] sm:$0xff] (!%p517_p13)  ;;  %1542 = vset.pattern.permute.xlu0 (!%p517_p13), %v1626_v9  ;;  %v1158_v10 = vld [vmem:[%s1884_s30 + $0x90] sm:$0xff] (!%p517_p13)  ;;  %s1155_s14 = sshll.u32 (!%p517_p13), %s1867_s25, 3  ;;  %s1226_s21 = sshll.u32 (!%p517_p13), %s1613_s18, 7 }
  0x44   : > { %v1889_v5 = vld [vmem:[%s1884_s30] sm:$0xff] (!%p517_p13)  ;;  %v1388_v6 = vpack.c.bf16 (!%p517_p13), %v1157_v4, %v1156_v3  ;;  %v1892_v7 = vld [vmem:[%s1884_s30 + $0x8] sm:$0xff] (!%p517_p13)  ;;  %v1159_v11 = vld [vmem:[%s1884_s30 + $0x98] sm:$0xff] (!%p517_p13)  ;;  %988 = vperm.xlu0 (!%p517_p13), %1542, %v985_v16   ;;  %s558_s22 = scalar_lea.vmem (!%p517_p13), [#allocation4], %s1155_s14  ;;  %s2092_s5 = scalar_lea.hbm (!%p517_p13), %s2145_s4, %s1226_s21 }
  0x45   : > { %v1420_v8 = vpack.c.bf16 (!%p517_p13), %v1892_v7, %v1889_v5  ;;  %v1905_v12 = vld [vmem:[%s1884_s30 + $0x10] sm:$0xff] (!%p517_p13)  ;;  %v1908_v13 = vld [vmem:[%s1884_s30 + $0x18] sm:$0xff] (!%p517_p13)  ;;  %v1392_v14 = vpack.c.bf16 (!%p517_p13), %v1159_v11, %v1158_v10  ;;  %v1160_v17 = vld [vmem:[%s1884_s30 + $0xa0] sm:$0xff] (!%p517_p13)  ;;  %v846_v52 = vrot.slane (!%p517_p13), %v1889_v5, 1  ;;  %v847_v53 = vrot.slane (!%p517_p13), %v1892_v7, 1  ;;  %s1011_s24 = sshll.u32 (!%p517_p13), %s558_s22, 4  ;;  %s2094_s24 = int_to_ptr.vmem [resolvable:$true] %s1011_s24 }
  0x46   : > { %1390 = vmatpush3.bf16.xpose.msk.msra.mxu0 (!%p517_p13), %vm1874_vm1, %v1388_v6  ;;  %v1424_v15 = vpack.c.bf16 (!%p517_p13), %v1908_v13, %v1905_v12  ;;  %v1161_v18 = vld [vmem:[%s1884_s30 + $0xa8] sm:$0xff] (!%p517_p13)  ;;  %v1924_v19 = vld [vmem:[%s1884_s30 + $0x20] sm:$0xff] (!%p517_p13)  ;;  %v1162_v23 = vld [vmem:[%s1884_s30 + $0xb0] sm:$0xff] (!%p517_p13)  ;;  %v849_v54 = vrot.slane (!%p517_p13), %v1905_v12, 1  ;;  %v851_v60 = vrot.slane (!%p517_p13), %v1908_v13, 1  ;;  %s997_s6 = scalar_lea.sflag (!%p517_p13), [#allocation5], %s1867_s25 }
  0x47   : > { %1422 = vmatpush3.bf16.xpose.msk.msra.mxu1 (!%p517_p13), %vm1874_vm1, %v1420_v8  ;;  %1391 = vmatprep.subr.bf16.mxu0 (!%p517_p13), %v1623_v0  ;;  %v1927_v20 = vld [vmem:[%s1884_s30 + $0x28] sm:$0xff] (!%p517_p13)  ;;  %v1396_v21 = vpack.c.bf16 (!%p517_p13), %v1161_v18, %v1160_v17  ;;  %v1163_v24 = vld [vmem:[%s1884_s30 + $0xb8] sm:$0xff] (!%p517_p13)  ;;  %v1940_v25 = vld [vmem:[%s1884_s30 + $0x30] sm:$0xff] (!%p517_p13)  ;;  %v848_v56 = vsel (!%p517_p13), %vm845_vm3, %v846_v52, %v847_v53  ;;  %v853_v61 = vrot.slane (!%p517_p13), %v1924_v19, 1  ;;  %s1543_s7 = scalar_lea.vmem (!%p517_p13), %s2094_s24, 128  ;;  %s1627_s18 = smov (!%p517_p13), [#allocation4]  }
  0x48   : > { %1423 = vmatprep.subr.bf16.mxu1 %v1623_v0  ;;  %v1428_v22 = vpack.c.bf16 %v1927_v20, %v1924_v19  ;;  %v1943_v26 = vld [vmem:[%s1884_s30 + $0x38] sm:$0xff]  ;;  %v1400_v27 = vpack.c.bf16 %v1163_v24, %v1162_v23  ;;  %v1164_v29 = vld [vmem:[%s1884_s30 + $0xc0] sm:$0xff]  ;;  %v1165_v30 = vld [vmem:[%s1884_s30 + $0xc8] sm:$0xff]  ;;  %v850_v57 = vsel %vm845_vm3, %v847_v53, %v849_v54  ;;  %v852_v63 = vsel %vm845_vm3, %v849_v54, %v851_v60  ;;  %p1544_p0 = scmp.ne.s32.totalorder %s2094_s24, %s1543_s7  ;;  %s1547_s8 = sshll.u32 %s1627_s18, 4  ;;  %s1548_s8 = int_to_ptr.vmem [resolvable:$false] %s1547_s8 }
  0x49   : > { %v1432_v28 = vpack.c.bf16 %v1943_v26, %v1940_v25  ;;  %v1956_v31 = vld [vmem:[%s1884_s30 + $0x40] sm:$0xff]  ;;  %v1959_v32 = vld [vmem:[%s1884_s30 + $0x48] sm:$0xff]  ;;  %v1404_v33 = vpack.c.bf16 %v1165_v30, %v1164_v29  ;;  %v1166_v35 = vld [vmem:[%s1884_s30 + $0xd0] sm:$0xff]  ;;  %v1452_v59 = vpack.c.bf16 %v850_v57, %v848_v56  ;;  %v854_v3 = vsel %vm845_vm3, %v851_v60, %v853_v61  ;;  %s1549_s9 = scalar_lea.vmem %s1548_s8, 256  ;;  %p1550_p3 = scmp.lt.s32.totalorder %s2094_s24, %s1548_s8 }
  0x4a   : > { %v1436_v34 = vpack.c.bf16 %v1959_v32, %v1956_v31  ;;  %v1167_v36 = vld [vmem:[%s1884_s30 + $0xd8] sm:$0xff]  ;;  %v1972_v37 = vld [vmem:[%s1884_s30 + $0x50] sm:$0xff]  ;;  %v1168_v41 = vld [vmem:[%s1884_s30 + $0xe0] sm:$0xff]  ;;  %v1456_v4 = vpack.c.bf16 %v854_v3, %v852_v63  ;;  %v855_v5 = vrot.slane %v1927_v20, 1  ;;  %v857_v6 = vrot.slane %v1940_v25, 1  ;;  %p1545_p1 = pnand %p1544_p0, %p1696_p5  ;;  %p1551_p4 = scmp.lt.s32.totalorder %s1549_s9, %s1543_s7 }
  0x4b   : > { %v1975_v38 = vld [vmem:[%s1884_s30 + $0x58] sm:$0xff]  ;;  %v1408_v39 = vpack.c.bf16 %v1167_v36, %v1166_v35  ;;  %v1169_v42 = vld [vmem:[%s1884_s30 + $0xe8] sm:$0xff]  ;;  %v1988_v43 = vld [vmem:[%s1884_s30 + $0x60] sm:$0xff]  ;;  %v859_v10 = vrot.slane %v1943_v26, 1  ;;  %v861_v11 = vrot.slane %v1956_v31, 1 }
  0x4c   : > { %v1440_v40 = vpack.c.bf16 %v1975_v38, %v1972_v37  ;;  %v1991_v44 = vld [vmem:[%s1884_s30 + $0x68] sm:$0xff]  ;;  %v1412_v45 = vpack.c.bf16 %v1169_v42, %v1168_v41  ;;  %v1170_v47 = vld [vmem:[%s1884_s30 + $0xf0] sm:$0xff]  ;;  %v1171_v48 = vld [vmem:[%s1884_s30 + $0xf8] sm:$0xff]  ;;  %v856_v7 = vsel %vm845_vm3, %v853_v61, %v855_v5  ;;  %v858_v8 = vsel %vm845_vm3, %v855_v5, %v857_v6  ;;  %p1546_p2 = pneg %p1545_p1  ;;  %p1552_p6 = por %p1551_p4, %p1550_p3 }
  0x4d   : > { %v1444_v46 = vpack.c.bf16 %v1991_v44, %v1988_v43  ;;  %v2004_v49 = vld [vmem:[%s1884_s30 + $0x70] sm:$0xff]  ;;  %v2007_v50 = vld [vmem:[%s1884_s30 + $0x78] sm:$0xff]  ;;  %v1416_v51 = vpack.c.bf16 %v1171_v48, %v1170_v47  ;;  %v1460_v9 = vpack.c.bf16 %v858_v8, %v856_v7  ;;  %v862_v12 = vsel %vm845_vm3, %v859_v10, %v861_v11 }
  0x4e   : > { %1394 = vmatpush3.bf16.xpose.msk.msra.mxu0 %vm1874_vm1, %v1392_v14  ;;  %v1448_v55 = vpack.c.bf16 %v2007_v50, %v2004_v49  ;;  %v863_v14 = vrot.slane %v1959_v32, 1  ;;  %v867_v19 = vrot.slane %v1975_v38, 1  ;;  %v869_v20 = vrot.slane %v1988_v43, 1  ;;  %v1207_v35 = vld [vmem:[%s2143_s2 + $0x10] sm:$0xff]  ;;  %p1553_p7 = pnand %p1552_p6, %p1546_p2 }
  0x4f   : > { %1426 = vmatpush3.bf16.xpose.msk.msra.mxu1 %vm1874_vm1, %v1424_v15  ;;  %1395 = vmatprep.subr.bf16.mxu0 %v1623_v0  ;;  %v865_v15 = vrot.slane %v1972_v37, 1  ;;  %v871_v24 = vrot.slane %v1991_v44, 1  ;;  %v873_v25 = vrot.slane %v2004_v49, 1  ;;  %v875_v30 = vrot.slane %v2007_v50, 1 }
  0x50   : > { %1427 = vmatprep.subr.bf16.mxu1 %v1623_v0  ;;  %v864_v16 = vsel %vm845_vm3, %v861_v11, %v863_v14 }
  0x51   : > { %v866_v17 = vsel %vm845_vm3, %v863_v14, %v865_v15  ;;  %v872_v26 = vsel %vm845_vm3, %v869_v20, %v871_v24  ;;  %v876_v32 = vsel %vm845_vm3, %v873_v25, %v875_v30 }
  0x52   : > { %v1468_v18 = vpack.c.bf16 %v866_v17, %v864_v16 }
  0x56   : > { %1398 = vmatpush3.bf16.xpose.msk.msra.mxu0 %vm1874_vm1, %v1396_v21  ;;  %v868_v21 = vsel %vm845_vm3, %v865_v15, %v867_v19 }
  0x57   : > { %1430 = vmatpush3.bf16.xpose.msk.msra.mxu1 %vm1874_vm1, %v1428_v22  ;;  %1399 = vmatprep.subr.bf16.mxu0 %v1623_v0  ;;  %v870_v22 = vsel %vm845_vm3, %v867_v19, %v869_v20 }
  0x58   : > { %1431 = vmatprep.subr.bf16.mxu1 %v1623_v0  ;;  %v1472_v23 = vpack.c.bf16 %v870_v22, %v868_v21 }
  0x5e   : > { %1402 = vmatpush3.bf16.xpose.msk.msra.mxu0 %vm1874_vm1, %v1400_v27  ;;  %v874_v27 = vsel %vm845_vm3, %v871_v24, %v873_v25 }
  0x5f   : > { %1434 = vmatpush3.bf16.xpose.msk.msra.mxu1 %vm1874_vm1, %v1432_v28  ;;  %1403 = vmatprep.subr.bf16.mxu0 %v1623_v0  ;;  %v841_v28 = vld [vmem:[%s532_s11] sm:$0xff]  ;;  %v1476_v29 = vpack.c.bf16 %v874_v27, %v872_v26 }
  0x60   : > { %1435 = vmatprep.subr.bf16.mxu1 %v1623_v0  ;;  %v877_v31 = vrot.slane %v841_v28, 1 }
  0x66   : > { %1406 = vmatpush3.bf16.xpose.msk.msra.mxu0 %vm1874_vm1, %v1404_v33  ;;  %v878_v33 = vsel %vm845_vm3, %v875_v30, %v877_v31 }
  0x67   : > { %1438 = vmatpush3.bf16.xpose.msk.msra.mxu1 %vm1874_vm1, %v1436_v34  ;;  %1407 = vmatprep.subr.bf16.mxu0 %v1623_v0  ;;  %v1480_v34 = vpack.c.bf16 %v878_v33, %v876_v32 }
  0x68   : > { %1439 = vmatprep.subr.bf16.mxu1 %v1623_v0 }
  0x6e   : > { %1410 = vmatpush3.bf16.xpose.msk.msra.mxu0 %vm1874_vm1, %v1408_v39 }
  0x6f   : > { %1442 = vmatpush3.bf16.xpose.msk.msra.mxu1 %vm1874_vm1, %v1440_v40  ;;  %1411 = vmatprep.subr.bf16.mxu0 %v1623_v0 }
  0x70   : > { %1443 = vmatprep.subr.bf16.mxu1 %v1623_v0 }
  0x76   : > { %1414 = vmatpush3.bf16.xpose.msk.msra.mxu0 %vm1874_vm1, %v1412_v45 }
  0x77   : > { %1446 = vmatpush3.bf16.xpose.msk.msra.mxu1 %vm1874_vm1, %v1444_v46  ;;  %1415 = vmatprep.subr.bf16.mxu0 %v1623_v0 }
  0x78   : > { %1447 = vmatprep.subr.bf16.mxu1 %v1623_v0 }
  0x7e   : > { %1418 = vmatpush3.bf16.xpose.msk.msra.mxu0 %vm1874_vm1, %v1416_v51 }
  0x7f   : > { %1450 = vmatpush3.bf16.xpose.msk.msra.mxu1 %vm1874_vm1, %v1448_v55  ;;  %1451 = vmatprep.subr.bf16.mxu0 %v1623_v0 }
  0x85   : > { %1315 = vmatmul.mubr.msk.f32.vlgmr.msra.gmra.mrb[0].mxu0 %vm598_vm0, %v1172_v58 }
  0x86   : > { %1350 = vmatmul.mubr.msk.f32.vlgmr.msra.gmra.mrb[0].mxu1 %vm598_vm0, %v578_v62  ;;  %1454 = vmatpush3.bf16.xpose.msk.msra.mxu0 %vm1874_vm1, %v1452_v59 }
  0x87   : > { %1455 = vmatprep.subr.bf16.mxu0 %v1623_v0  ;;  %1384 = vmatprep.mubr.msk.f32.mxu0 %vm1624_vm2, %v1625_v2  ;;  %v860_v2 = vsel %vm845_vm3, %v857_v6, %v859_v10 }
  0x88   : > { %v1464_v13 = vpack.c.bf16 %v862_v12, %v860_v2 }
  0x8e   : > { %1458 = vmatpush3.bf16.xpose.msk.msra.mxu0 %vm1874_vm1, %v1456_v4 }
  0x8f   : > { %1459 = vmatprep.subr.bf16.mxu0 %v1623_v0 }
  0x96   : > { %1462 = vmatpush3.bf16.xpose.msk.msra.mxu0 %vm1874_vm1, %v1460_v9 }
  0x97   : > { %1463 = vmatprep.subr.bf16.mxu0 %v1623_v0 }
  0x9e   : > { %1466 = vmatpush3.bf16.xpose.msk.msra.mxu0 %vm1874_vm1, %v1464_v13 }
  0x9f   : > { %1467 = vmatprep.subr.bf16.mxu0 %v1623_v0 }
  0xa6   : > { %1470 = vmatpush3.bf16.xpose.msk.msra.mxu0 %vm1874_vm1, %v1468_v18 }
  0xa7   : > { %1471 = vmatprep.subr.bf16.mxu0 %v1623_v0 }
  0xae   : > { %1474 = vmatpush3.bf16.xpose.msk.msra.mxu0 %vm1874_vm1, %v1472_v23 }
  0xaf   : > { %1475 = vmatprep.subr.bf16.mxu0 %v1623_v0 }
  0xb6   : > { %1478 = vmatpush3.bf16.xpose.msk.msra.mxu0 %vm1874_vm1, %v1476_v29 }
  0xb7   : > { %1479 = vmatprep.subr.bf16.mxu0 %v1623_v0 }
  0xbe   : > { %1482 = vmatpush3.bf16.xpose.msk.msra.mxu0 %vm1874_vm1, %v1480_v34 }
  0xc3   : > { %v989_v41 = vpop.permute.xlu0 %988 }
  0xc5   : > { %1385 = vmatmul.mubr.msk.f32.vlgmr.msra.gmra.mrb[2].mxu0 %vm598_vm0, %v1207_v35 }
 0x158   : > { %v716_v36 = vpop.f32.mrb[0].mxu0 }
 0x159   : > { %v1316_v37 = vpop.f32.mrb[1].mxu0  ;;  %v837_v38 = vpop.f32.mrb[0].mxu1 }
 0x15a   : > { %v838_v39 = vadd.f32 %v837_v38, %v716_v36  ;;  %v1351_v0 = vpop.f32.mrb[1].mxu1 }
 0x198   : > { %v980_v40 = vpop.f32.mrb[2].mxu0 }
 0x199   : > { %v984_v42 = vadd.f32 %v980_v40, %v838_v39  ;;  %v1386_v43 = vpop.f32.mrb[3].mxu0 }
 0x19b   : > { %v991_v1 = vadd.f32 %v989_v41, %v984_v42 }
 0x19d   : > { %vm992_vm4 = vcmp.ge.f32.partialorder %v991_v1, 0.0  ;;  %v993_v44 = vmul.f32 0.01, %v991_v1 }
 0x19f   : > { %v994_v45 = vsel %vm992_vm4, %v991_v1, %v993_v44 }
 0x1a0   : > { %995 = vst [vmem:[%s558_s22] sm:$0xff] %v994_v45 }
 0x1a1   : > { %1556 = shalt.err (!%p1553_p7)
}
 0x1a2   : > { %s1557_s25 = scalar_lea.hbm %s2092_s5, 128  ;;  %s1561_s12 = scalar_lea.hbm %s2145_s4, 256 }
 0x1a3   : > { %p1558_p8 = scmp.ne.s32.totalorder %s2092_s5, %s1557_s25  ;;  %p1562_p13 = scmp.lt.u32.totalorder %s2092_s5, %s2145_s4 }
 0x1a4   : > { %p1563_p0 = scmp.lt.u32.totalorder %s1561_s12, %s1557_s25  ;;  %p1565_p2 = scmp.lt.u32.totalorder %s1557_s25, %s2092_s5 }
 0x1a5   : > { %p1559_p11 = pnand %p1558_p8, %p1696_p5 }
 0x1a6   : > { %p1564_p1 = por %p1563_p0, %p1562_p13 }
 0x1a7   : > { %p1560_p12 = pneg %p1559_p11 }
 0x1a8   : > { %p1566_p3 = por %p1565_p2, %p1564_p1 }
 0x1aa   : > { %p1567_p4 = pnand %p1566_p3, %p1560_p12 }
 0x1ac   : > { %1570 = shalt.err (!%p1567_p4)
}
 0x1ad   : > { %1483 = dma.vmem_to_hbm [thread:$0]  (%p1696_p5), %s2094_s24, 128, %s2092_s5, %s997_s6  }
 0x1ae PF: > { %s1023_s21 = sand.u32 1, %s1601_s15   ;;  %p1486_p6 = pnand %p1113_p10, %p1707_p9 }
 0x1af   : > { %s1024_s22 = scalar_lea.sflag [#allocation5], %s1023_s21 }
 0x1b0   : > { %1596 = dma.done.wait (!%p1486_p6), %s1024_s22, 128  }
 0x1b1   : > { %1598 = vsyncadd (!%p1486_p6), %s1024_s22, 4294967168  ;;  %s17_s20 = sadd.s32 1, %s1621_s20   ;;  %s2151_s15 = smov %s1605_s16 }
 0x1b2   : > { %p14_p7 = scmp.ge.s32.totalorder %s17_s20, 4   ;;  %s2152_s16 = smov %s1609_s17 }
 0x1b3   : > { %s2153_s17 = smov %s1705_s28  ;;  %s2154_s18 = smov %s1617_s19 }
 0x1b4   : > { %s2155_s19 = smov %s2157_s23  ;;  %16 = sbr.rel (!%p14_p7) target bundleno = 4 (0x4), region = 163 }
 0x1bb   :  { %1029 = vsyncpa [#allocation5], 1 }
 0x1bc   :  { %1031 = vsyncpa [#allocation5 + $0x1], 1 }

</bundles_post_ra>
